<compile_context>
chip_gen: v6e
topology: v6e:2x2x1
jax: 0.10.0
libtpu: 0.0.40
codegen_flags: <defaults>
</compile_context>

<pallas_src>
import jax
import jax.numpy as jnp
from jax.experimental import pallas as pl
from jax.experimental.pallas import tpu as pltpu

IN_FEATURES = 10
OUT_FEATURES = 20
OUT_PADDED = 128            # lane-dense output width (multiple of 128)
MAX_BATCH_TILE = 512        # rows per grid step; small enough for v7x's 64 MiB VMEM


def _round_up(x, m):
    return (x + m - 1) // m * m


def prepare_linear_params(weight, bias):
    """One-time parameter layout: [20,10] PyTorch weight -> [10,128] padded, bias -> [1,128].

    Call this once at init; do NOT put it inside the per-step traced path.
    """
    w_t = weight.T  # (IN, OUT)
    w_pad = jnp.zeros((IN_FEATURES, OUT_PADDED), weight.dtype)
    w_pad = w_pad.at[:, :OUT_FEATURES].set(w_t)
    b_pad = jnp.zeros((1, OUT_PADDED), bias.dtype)
    b_pad = b_pad.at[0, :OUT_FEATURES].set(bias)
    return w_pad, b_pad


def linear_kernel(x_ref, w_ref, b_ref, o_ref):
    # x_ref: (TB, IN), w_ref: (IN, 128), b_ref: (1, 128), o_ref: (TB, 128)
    acc = jnp.dot(x_ref[...], w_ref[...], preferred_element_type=jnp.float32)
    o_ref[...] = (acc + b_ref[...]).astype(o_ref.dtype)


def multi_layer_policy(features, w_pad, b_pad):
    """features: [B, 10], w_pad: [10, 128], b_pad: [1, 128] -> [B, 20]."""
    B = features.shape[0]
    tb = min(MAX_BATCH_TILE, _round_up(B, 8))  # sublane-aligned batch tile
    grid = (pl.cdiv(B, tb),)

    out_padded = pl.pallas_call(
        linear_kernel,
        out_shape=jax.ShapeDtypeStruct((B, OUT_PADDED), features.dtype),
        grid_spec=pltpu.PrefetchScalarGridSpec(
            num_scalar_prefetch=0,
            grid=grid,
            in_specs=[
                # features: tiled over batch
                pl.BlockSpec((tb, IN_FEATURES), lambda i: (i, 0)),
                # weight/bias: constant index_map -> DMA'd once, VMEM-resident
                pl.BlockSpec((IN_FEATURES, OUT_PADDED), lambda i: (0, 0)),
                pl.BlockSpec((1, OUT_PADDED), lambda i: (0, 0)),
            ],
            out_specs=pl.BlockSpec((tb, OUT_PADDED), lambda i: (i, 0)),
        ),
        compiler_params=pltpu.CompilerParams(
            # batch tiles are independent -> shard across TensorCores on v7x
            dimension_semantics=("parallel",)
        ),
    )(features, w_pad, b_pad)

    # Back to the logical [B, 20] output of the PyTorch module.
    return out_padded[:, :OUT_FEATURES]


if __name__ == "__main__":
    key = jax.random.PRNGKey(0)
    k_x, k_w, k_b = jax.random.split(key, 3)

    batch = 2
    features = jax.random.normal(k_x, (batch, IN_FEATURES), dtype=jnp.float32)
    # Deterministic synthetic params (same shapes as nn.Linear(10, 20)).
    weight = jax.random.normal(k_w, (OUT_FEATURES, IN_FEATURES), dtype=jnp.float32) * 0.1
    bias = jax.random.normal(k_b, (OUT_FEATURES,), dtype=jnp.float32) * 0.1

    # One-time parameter layout (outside the hot path).
    w_pad, b_pad = prepare_linear_params(weight, bias)

    out = multi_layer_policy(features, w_pad, b_pad)
    jax.block_until_ready(out)

    # Pure-JAX reference check.
    ref = features @ weight.T + bias
    assert out.shape == (batch, OUT_FEATURES)
    assert jnp.allclose(out, ref, atol=1e-5, rtol=1e-5)

    print("KERNEL_OK")
</pallas_src>

<mosaic_0001>
module attributes {stable_mosaic.version = 11 : i64} {
  func.func @linear_kernel(%arg0: i32, %arg1: memref<8x10xf32, #tpu.memory_space<vmem>>, %arg2: memref<10x128xf32, #tpu.memory_space<vmem>>, %arg3: memref<1x128xf32, #tpu.memory_space<vmem>>, %arg4: memref<8x128xf32, #tpu.memory_space<vmem>>) attributes {dimension_semantics = [#tpu.dimension_semantics<parallel>], iteration_bounds = array<i64: 1>, scalar_prefetch = 0 : i64, scratch_operands = 0 : i64, tpu.core_type = #tpu.core_type<tc>, window_params = [{transform_indices = @transform_0, window_bounds = array<i64: 8, 10>}, {pipeline_mode = #tpu.pipeline_mode<synchronous>, transform_indices = @transform_1, window_bounds = array<i64: 10, 128>}, {pipeline_mode = #tpu.pipeline_mode<synchronous>, transform_indices = @transform_2, window_bounds = array<i64: 1, 128>}, {transform_indices = @transform_3, window_bounds = array<i64: 8, 128>}]} {
    %c0 = arith.constant 0 : index
    %c0_0 = arith.constant 0 : index
    %0 = vector.load %arg1[%c0, %c0_0] : memref<8x10xf32, #tpu.memory_space<vmem>>, vector<8x10xf32>
    %c0_1 = arith.constant 0 : index
    %c0_2 = arith.constant 0 : index
    %1 = vector.load %arg2[%c0_1, %c0_2] : memref<10x128xf32, #tpu.memory_space<vmem>>, vector<10x128xf32>
    %cst = arith.constant dense<0.000000e+00> : vector<8x128xf32>
    %2 = tpu.matmul %0, %1, %cst {dimension_numbers = #tpu.dot_dimension_numbers<[1], [0], [0], [1], [0, 0, 1, 1], [], []>} : vector<8x10xf32>, vector<10x128xf32>, vector<8x128xf32> -> vector<8x128xf32>
    %c0_3 = arith.constant 0 : index
    %c0_4 = arith.constant 0 : index
    %3 = vector.load %arg3[%c0_3, %c0_4] : memref<1x128xf32, #tpu.memory_space<vmem>>, vector<1x128xf32>
    %4 = vector.broadcast %3 : vector<1x128xf32> to vector<8x128xf32>
    %5 = arith.addf %2, %4 : vector<8x128xf32>
    %c0_5 = arith.constant 0 : index
    %c0_6 = arith.constant 0 : index
    %6 = vector.load %arg4[%c0_5, %c0_6] : memref<8x128xf32, #tpu.memory_space<vmem>>, vector<8x128xf32>
    tpu.vector_store %arg4[%c0_5, %c0_6], %5 {strides = array<i32>} : memref<8x128xf32, #tpu.memory_space<vmem>>, vector<8x128xf32>,
    return
  }
  func.func @transform_0(%arg0: i32) -> (i32, i32) {
    %c0_i32 = arith.constant 0 : i32
    %c0_i32_0 = arith.constant 0 : i32
    return %arg0, %c0_i32 : i32, i32
  }
  func.func @transform_1(%arg0: i32) -> (i32, i32) {
    %c0_i32 = arith.constant 0 : i32
    %c0_i32_0 = arith.constant 0 : i32
    %c0_i32_1 = arith.constant 0 : i32
    return %c0_i32, %c0_i32_0 : i32, i32
  }
  func.func @transform_2(%arg0: i32) -> (i32, i32) {
    %c0_i32 = arith.constant 0 : i32
    %c0_i32_0 = arith.constant 0 : i32
    %c0_i32_1 = arith.constant 0 : i32
    return %c0_i32, %c0_i32_0 : i32, i32
  }
  func.func @transform_3(%arg0: i32) -> (i32, i32) {
    %c0_i32 = arith.constant 0 : i32
    %c0_i32_0 = arith.constant 0 : i32
    return %arg0, %c0_i32 : i32, i32
  }
}

</mosaic_0001>

<bundles_post_ra>
// kernel: tpu_custom_call.1
= control target key start
LH: loop header
LB: loop body
LE: loop exit
PB: predicated region body
PF: predicated region fallthrough
CT: control target
= control target key end

     0   :  { %8 = vsyncpa [#allocation3], 0  ;;  %s285_s0 = inlined_call_operand.hbm [shape: f32[2,10], index: 0, kind: input, shape index: {}]   ;;  %s286_s1 = inlined_call_operand.hbm [shape: f32[10,128], index: 1, kind: input, shape index: {}]   ;;  %s287_s2 = inlined_call_operand.vmem [shape: f32[1,128], index: 2, kind: input, shape index: {}]   ;;  %s288_s3 = inlined_call_operand.hbm [shape: f32[2,128], index: 3, kind: output, shape index: {}]  }
   0x1   :  { %9 = vsyncpa [#allocation6], 0 }
   0x2   :  { %10 = vsyncpa [#allocation4], 0 }
   0x3   :  { %15 = vsyncadd [#allocation3], 96  ;;  %s238_s12 = smov [#allocation2]  }
   0x4   :  { %s16_s13 = sshll.u32 %s238_s12, 4  ;;  %s17_s13 = int_to_ptr.vmem [resolvable:$true] %s16_s13 }
   0x5   :  { %s180_s14 = scalar_lea.vmem %s17_s13, 32  ;;  %s184_s15 = scalar_lea.vmem %s17_s13, 128 }
   0x6   :  { %p181_p0 = scmp.ne.s32.totalorder %s17_s13, %s180_s14  ;;  %p185_p1 = scmp.lt.s32.totalorder %s17_s13, %s17_s13 }
   0x7   :  { %p186_p2 = scmp.lt.s32.totalorder %s184_s15, %s180_s14 }
   0x9   :  { %p187_p3 = por %p186_p2, %p185_p1 }
   0xb   :  { %p188_p4 = pnand %p187_p3, %p181_p0 }
   0xd   :  { %191 = shalt.err (!%p188_p4)
}
   0xe   :  { %s239_s16 = smov 32   ;;  %s240_s17 = smov 2  }
   0xf   :  { %22 = dma.hbm_to_vmem [thread:$0]  %s285_s0, 32, %s17_s13, [#allocation3], %s239_s16, %s239_s16, %s240_s17  }
  0x10   :  { %s241_s20 = smov [#allocation5]  }
  0x11   :  { %s28_s21 = sshll.u32 %s241_s20, 4  ;;  %s29_s21 = int_to_ptr.vmem [resolvable:$true] %s28_s21 }
  0x12   :  { %s200_s22 = scalar_lea.vmem %s29_s21, 256  ;;  %p205_p6 = scmp.lt.s32.totalorder %s29_s21, %s29_s21 }
  0x13   :  { %p201_p5 = scmp.ne.s32.totalorder %s29_s21, %s200_s22  ;;  %p206_p7 = scmp.lt.s32.totalorder %s200_s22, %s200_s22 }
  0x15   :  { %p207_p8 = por %p206_p7, %p205_p6 }
  0x17   :  { %p208_p9 = pnand %p207_p8, %p201_p5 }
  0x19   :  { %211 = shalt.err (!%p208_p9)
}
  0x1a   :  { %s242_s23 = smov 128   ;;  %s243_s24 = smov 8  }
  0x1b   :  { %34 = dma.hbm_to_vmem [thread:$0]  %s286_s1, 256, %s29_s21, [#allocation6], %s242_s23, %s242_s23, %s243_s24  }
  0x1c   :  { %232 = dma.done.wait [#allocation3], 128  }
  0x1d   :  { %233 = vsyncadd [#allocation3], 4294967168 }
  0x1e   :  { %234 = dma.done.wait [#allocation6], 256  }
  0x1f   :  { %235 = vsyncadd [#allocation6], 4294967040  ;;  %v244_v0 = vmov 0.0   ;;  %vm245_vm0 = vmmov 0   ;;  %vm57_vm1 = vcmask 1041408   ;;  %v44_v2 = vld [vmem:[#allocation5] sm:$0xff] }
  0x20   :  { %156 = vmatprep.subr.mxu0 %v244_v0  ;;  %160 = vmatprep.mubr.msk.f32.mxu0 %vm245_vm0, %v244_v0  ;;  %v45_v1 = vld [vmem:[#allocation5 + $0x8] sm:$0x3]  ;;  %v43_v3 = vld [vmem:[#allocation2] sm:$0xff]  ;;  %vm53_vm2 = vcmask 80896  }
  0x21   :  { %157 = vmatpush3.msk.msra.mxu0 %vm57_vm1, %v45_v1  ;;  %v150_v4 = vld [vmem:[%s287_s2] ss:$0 sm:$0xff] }
  0x22   :  { %158 = vmatprep.subr.mxu0 %v244_v0 }
  0x23   :  { %159 = vmatpush3.msra.mxu0 %v44_v2 }
  0x24   :  { %161 = vmatmul.mubr.msk.f32.vlgmr.msra.gmra.mxu0 %vm53_vm2, %v43_v3 }
  0xe4   :  { %v127_v5 = vpop.f32.mrf.mxu0 }
  0xe5   :  { %v128_v6 = vadd.f32 %v150_v4, %v127_v5 }
  0xe6   :  { %v162_v7 = vpop.f32.mrf.mxu0 }
  0xe7   :  { %131 = vst [vmem:[#allocation7] sm:$0xff] %v128_v6 }
  0xe8   :  { %136 = vsyncadd [#allocation4], 96  ;;  %s246_s1 = smov [#allocation7]  }
  0xe9   :  { %s137_s28 = sshll.u32 %s246_s1, 4  ;;  %s138_s28 = int_to_ptr.vmem [resolvable:$true] %s137_s28 }
  0xea   :  { %s212_s29 = scalar_lea.vmem %s138_s28, 32  ;;  %s216_s30 = scalar_lea.vmem %s138_s28, 128 }
  0xeb   :  { %p213_p10 = scmp.ne.s32.totalorder %s138_s28, %s212_s29  ;;  %p217_p11 = scmp.lt.s32.totalorder %s138_s28, %s138_s28 }
  0xec   :  { %p218_p12 = scmp.lt.s32.totalorder %s216_s30, %s212_s29 }
  0xee   :  { %p219_p13 = por %p218_p12, %p217_p11 }
  0xf0   :  { %p220_p0 = pnand %p219_p13, %p213_p10 }
  0xf2   :  { %223 = shalt.err (!%p220_p0)
}
  0xf3   :  { %143 = dma.vmem_to_hbm [thread:$0]  %s138_s28, 32, %s288_s3, [#allocation4], %s239_s16, %s239_s16, %s240_s17  }
  0xf4   :  { %236 = dma.done.wait [#allocation4], 128  }
  0xf5   :  { %237 = vsyncadd [#allocation4], 4294967168 }
  0xf6   :  { %147 = vsyncpa [#allocation3], 1 }
  0xf7   :  { %148 = vsyncpa [#allocation6], 1 }
  0xf8   :  { %149 = vsyncpa [#allocation4], 1 }

</bundles_post_ra>
